<compile_context>
chip_gen: v5e
topology: v5e:2x2
jax: 0.10.0
libtpu: 0.0.40
codegen_flags: <defaults>
</compile_context>

<pallas_src>
import functools

import jax
import jax.numpy as jnp
from jax.experimental import pallas as pl
from jax.experimental.pallas import tpu as pltpu

LANE = 128      # TPU lane width: feature dims padded to this -> unmasked stores
MAX_TB = 1024   # cap on rows of x per grid step (VMEM ~1.5 MiB at this size)


def _round_up(n, m):
    return (n + m - 1) // m * m


def _choose_tb(b):
    """~Two balanced tiles for small B (keeps both v7x TCs busy), 1024 cap."""
    bp8 = _round_up(max(b, 1), 8)
    half = _round_up((bp8 + 1) // 2, 8)
    return min(MAX_TB, half)


def _silu_f32(h):
    # Exact SiLU with a single EUP transcendental:
    #   sigmoid(h) = 0.5 * (1 + tanh(0.5 * h))   (tanh saturates safely).
    return h * (0.5 + 0.5 * jnp.tanh(0.5 * h))


# ----------------------------- Pallas kernel ------------------------------ #
def _coda_mlp_kernel(x_ref, w1_ref, b1_ref, w2_ref, b2_ref, w3_ref, b3_ref,
                     o_ref):
    # x tile: [TB, D_IN] native dtype; cast to bf16 in-kernel (near-free).
    x = x_ref[...].astype(jnp.bfloat16)

    # layer 1: Linear + SiLU  (bf16 MXU inputs, f32 accumulate, f32 activation)
    h = jnp.dot(x, w1_ref[...], preferred_element_type=jnp.float32) + b1_ref[...]
    h = _silu_f32(h)

    # layer 2: Linear + SiLU
    h = jnp.dot(h.astype(jnp.bfloat16), w2_ref[...],
                preferred_element_type=jnp.float32) + b2_ref[...]
    h = _silu_f32(h)

    # layer 3: Linear (output) — lane-dense 128-wide unmasked store, in-kernel
    # downcast to the output dtype.
    out = jnp.dot(h.astype(jnp.bfloat16), w3_ref[...],
                  preferred_element_type=jnp.float32) + b3_ref[...]
    o_ref[...] = out.astype(o_ref.dtype)


# --------------------------- weight preparation ---------------------------- #
def prepare_coda_weights(weights):
    """Zero-pad feature dims to 128 lanes and cast matmul operands to bf16.

    Done ONCE per task (cached by TaskCoDA), never per forward.
    """
    w1, b1, w2, b2, w3, b3 = weights
    d_in, hidden = w1.shape
    d_out = w3.shape[1]
    hp = _round_up(hidden, LANE)
    op = _round_up(d_out, LANE)

    def pad2(a, rows, cols):
        return jnp.pad(a, ((0, rows - a.shape[0]), (0, cols - a.shape[1])))

    prepared = (
        pad2(w1, d_in, hp).astype(jnp.bfloat16),
        pad2(b1, 1, hp).astype(jnp.float32),
        pad2(w2, hp, hp).astype(jnp.bfloat16),
        pad2(b2, 1, hp).astype(jnp.float32),
        pad2(w3, hp, op).astype(jnp.bfloat16),
        pad2(b3, 1, op).astype(jnp.float32),
    )
    return prepared, d_out


# ----------------------------- functional net ------------------------------ #
@functools.partial(jax.jit, static_argnames=("d_out", "tb"))
def coda_net_forward(x, prepared, *, d_out, tb=None):
    """Functional net.forward(x, weights) on pre-padded / pre-cast weights."""
    w1, b1, w2, b2, w3, b3 = prepared
    B, d_in = x.shape
    hp = w2.shape[0]
    out_pad = w3.shape[1]

    if tb is None:
        tb = _choose_tb(B)
    bp = _round_up(B, tb)
    xp = x if bp == B else jnp.pad(x, ((0, bp - B), (0, 0)))  # only when needed

    itemsize = jnp.dtype(x.dtype).itemsize
    cost = pl.CostEstimate(
        flops=2 * bp * (d_in * hp + hp * hp + hp * out_pad),
        transcendentals=2 * bp * hp,
        bytes_accessed=(bp * d_in * itemsize          # x
                        + bp * out_pad * itemsize      # padded output
                        + (d_in * hp + hp * hp + hp * out_pad) * 2  # bf16 weights
                        + (2 * hp + out_pad) * 4))     # f32 biases

    out = pl.pallas_call(
        _coda_mlp_kernel,
        out_shape=jax.ShapeDtypeStruct((bp, out_pad), x.dtype),
        grid=(bp // tb,),
        in_specs=[
            pl.BlockSpec((tb, d_in), lambda i: (i, 0)),    # stream x row-tiles
            # weights/biases: constant index_maps -> DMA'd once, VMEM-resident
            pl.BlockSpec(w1.shape, lambda i: (0, 0)),
            pl.BlockSpec(b1.shape, lambda i: (0, 0)),
            pl.BlockSpec(w2.shape, lambda i: (0, 0)),
            pl.BlockSpec(b2.shape, lambda i: (0, 0)),
            pl.BlockSpec(w3.shape, lambda i: (0, 0)),
            pl.BlockSpec(b3.shape, lambda i: (0, 0)),
        ],
        out_specs=pl.BlockSpec((tb, out_pad), lambda i: (i, 0)),
        compiler_params=pltpu.CompilerParams(
            dimension_semantics=("parallel",)),   # shard batch tiles over TCs (v7x)
        cost_estimate=cost,
    )(xp, w1, b1, w2, b2, w3, b3)

    # Single slice back to the logical shape (skip if downstream can consume
    # the 128-lane-padded layout directly).
    return out[:B, :d_out]


# ------------------------------ TaskCoDA glue ------------------------------ #
class TaskCoDA:
    """JAX mirror of the PyTorch TaskCoDA wrapper: forward(x) = net(x, weights)."""

    def __init__(self, net_forward, weights, xi, *, tb=None):
        self.net_forward = net_forward
        self.weights = weights
        self.xi = xi
        self._tb = tb
        # CoDA adaptation already baked into `weights`; padding/casting cached here.
        self._prepared, self._d_out = prepare_coda_weights(weights)

    def forward(self, x):
        return self.net_forward(x, self._prepared, d_out=self._d_out, tb=self._tb)

    def get_context(self):
        return self.xi


def _init_params(key, d_in, hidden, d_out, xi_dim):
    """Deterministic base params + hypernet params + context xi.

    CoDA: task weights = base weights + sum_k xi[k] * hyper_delta_k.
    The adaptation is computed ONCE here (not per forward).
    """
    ks = jax.random.split(key, 8)
    scale = 0.05
    shapes = [(d_in, hidden), (1, hidden),
              (hidden, hidden), (1, hidden),
              (hidden, d_out), (1, d_out)]
    base = [scale * jax.random.normal(ks[i], s, jnp.float32)
            for i, s in enumerate(shapes)]
    hyper = [scale * jax.random.normal(ks[6], (xi_dim,) + s, jnp.float32)
             for s in shapes]
    xi = jax.random.normal(ks[7], (xi_dim,), jnp.float32)
    weights = tuple(
        b + jnp.tensordot(xi, h, axes=([0], [0])) for b, h in zip(base, hyper)
    )
    return weights, xi


def _reference_forward(x, weights):
    """Plain-JAX reference: same bf16 matmul inputs / f32 accumulate / SiLU form."""
    w1, b1, w2, b2, w3, b3 = weights

    def mm(a, w):
        return jnp.dot(a.astype(jnp.bfloat16), w.astype(jnp.bfloat16),
                       preferred_element_type=jnp.float32)

    def silu(h):
        return h * (0.5 + 0.5 * jnp.tanh(0.5 * h))

    h = silu(mm(x, w1) + b1)
    h = silu(mm(h, w2) + b2)
    return mm(h, w3) + b3


if __name__ == "__main__":
    B, D_IN, HIDDEN, D_OUT, XI_DIM = 256, 32, 64, 32, 2

    key = jax.random.PRNGKey(0)
    kx, kp = jax.random.split(key)
    x = jax.random.normal(kx, (B, D_IN), jnp.float32)

    weights, xi = _init_params(kp, D_IN, HIDDEN, D_OUT, XI_DIM)
    task = TaskCoDA(coda_net_forward, weights, xi)

    out = task.forward(x)
    out = jax.block_until_ready(out)

    ref = _reference_forward(x, weights)
    assert out.shape == (B, D_OUT)
    assert bool(jnp.allclose(out, ref, atol=5e-3, rtol=5e-2)), (
        "max abs err = %g" % float(jnp.max(jnp.abs(out - ref))))

    print("KERNEL_OK")
</pallas_src>

<mosaic_0001>
module attributes {stable_mosaic.version = 11 : i64} {
  func.func @_coda_mlp_kernel(%arg0: i32, %arg1: memref<128x32xf32, #tpu.memory_space<vmem>>, %arg2: memref<32x128xbf16, #tpu.memory_space<vmem>>, %arg3: memref<1x128xf32, #tpu.memory_space<vmem>>, %arg4: memref<128x128xbf16, #tpu.memory_space<vmem>>, %arg5: memref<1x128xf32, #tpu.memory_space<vmem>>, %arg6: memref<128x128xbf16, #tpu.memory_space<vmem>>, %arg7: memref<1x128xf32, #tpu.memory_space<vmem>>, %arg8: memref<128x128xf32, #tpu.memory_space<vmem>>) attributes {dimension_semantics = [#tpu.dimension_semantics<parallel>], iteration_bounds = array<i64: 2>, scalar_prefetch = 0 : i64, scratch_operands = 0 : i64, tpu.core_type = #tpu.core_type<tc>, window_params = [{transform_indices = @transform_0, window_bounds = array<i64: 128, 32>}, {pipeline_mode = #tpu.pipeline_mode<synchronous>, transform_indices = @transform_1, window_bounds = array<i64: 32, 128>}, {pipeline_mode = #tpu.pipeline_mode<synchronous>, transform_indices = @transform_2, window_bounds = array<i64: 1, 128>}, {pipeline_mode = #tpu.pipeline_mode<synchronous>, transform_indices = @transform_3, window_bounds = array<i64: 128, 128>}, {pipeline_mode = #tpu.pipeline_mode<synchronous>, transform_indices = @transform_4, window_bounds = array<i64: 1, 128>}, {pipeline_mode = #tpu.pipeline_mode<synchronous>, transform_indices = @transform_5, window_bounds = array<i64: 128, 128>}, {pipeline_mode = #tpu.pipeline_mode<synchronous>, transform_indices = @transform_6, window_bounds = array<i64: 1, 128>}, {transform_indices = @transform_7, window_bounds = array<i64: 128, 128>}]} {
    %c0 = arith.constant 0 : index
    %c0_0 = arith.constant 0 : index
    %0 = vector.load %arg1[%c0, %c0_0] : memref<128x32xf32, #tpu.memory_space<vmem>>, vector<128x32xf32>
    %1 = arith.truncf %0 : vector<128x32xf32> to vector<128x32xbf16>
    %c0_1 = arith.constant 0 : index
    %c0_2 = arith.constant 0 : index
    %2 = vector.load %arg2[%c0_1, %c0_2] : memref<32x128xbf16, #tpu.memory_space<vmem>>, vector<32x128xbf16>
    %cst = arith.constant dense<0.000000e+00> : vector<128x128xf32>
    %3 = tpu.matmul %1, %2, %cst {dimension_numbers = #tpu.dot_dimension_numbers<[1], [0], [0], [1], [0, 0, 1, 1], [], []>} : vector<128x32xbf16>, vector<32x128xbf16>, vector<128x128xf32> -> vector<128x128xf32>
    %c0_3 = arith.constant 0 : index
    %c0_4 = arith.constant 0 : index
    %4 = vector.load %arg3[%c0_3, %c0_4] : memref<1x128xf32, #tpu.memory_space<vmem>>, vector<1x128xf32>
    %5 = vector.broadcast %4 : vector<1x128xf32> to vector<128x128xf32>
    %6 = arith.addf %3, %5 : vector<128x128xf32>
    %cst_5 = arith.constant 5.000000e-01 : f32
    %7 = vector.broadcast %cst_5 : f32 to vector<128x128xf32>
    %8 = arith.mulf %7, %6 : vector<128x128xf32>
    %9 = math.tanh %8 : vector<128x128xf32>
    %cst_6 = arith.constant 5.000000e-01 : f32
    %10 = vector.broadcast %cst_6 : f32 to vector<128x128xf32>
    %11 = arith.mulf %10, %9 : vector<128x128xf32>
    %cst_7 = arith.constant 5.000000e-01 : f32
    %12 = vector.broadcast %cst_7 : f32 to vector<128x128xf32>
    %13 = arith.addf %12, %11 : vector<128x128xf32>
    %14 = arith.mulf %6, %13 : vector<128x128xf32>
    %15 = arith.truncf %14 : vector<128x128xf32> to vector<128x128xbf16>
    %c0_8 = arith.constant 0 : index
    %c0_9 = arith.constant 0 : index
    %16 = vector.load %arg4[%c0_8, %c0_9] : memref<128x128xbf16, #tpu.memory_space<vmem>>, vector<128x128xbf16>
    %cst_10 = arith.constant dense<0.000000e+00> : vector<128x128xf32>
    %17 = tpu.matmul %15, %16, %cst_10 {dimension_numbers = #tpu.dot_dimension_numbers<[1], [0], [0], [1], [0, 0, 1, 1], [], []>} : vector<128x128xbf16>, vector<128x128xbf16>, vector<128x128xf32> -> vector<128x128xf32>
    %c0_11 = arith.constant 0 : index
    %c0_12 = arith.constant 0 : index
    %18 = vector.load %arg5[%c0_11, %c0_12] : memref<1x128xf32, #tpu.memory_space<vmem>>, vector<1x128xf32>
    %19 = vector.broadcast %18 : vector<1x128xf32> to vector<128x128xf32>
    %20 = arith.addf %17, %19 : vector<128x128xf32>
    %cst_13 = arith.constant 5.000000e-01 : f32
    %21 = vector.broadcast %cst_13 : f32 to vector<128x128xf32>
    %22 = arith.mulf %21, %20 : vector<128x128xf32>
    %23 = math.tanh %22 : vector<128x128xf32>
    %cst_14 = arith.constant 5.000000e-01 : f32
    %24 = vector.broadcast %cst_14 : f32 to vector<128x128xf32>
    %25 = arith.mulf %24, %23 : vector<128x128xf32>
    %cst_15 = arith.constant 5.000000e-01 : f32
    %26 = vector.broadcast %cst_15 : f32 to vector<128x128xf32>
    %27 = arith.addf %26, %25 : vector<128x128xf32>
    %28 = arith.mulf %20, %27 : vector<128x128xf32>
    %29 = arith.truncf %28 : vector<128x128xf32> to vector<128x128xbf16>
    %c0_16 = arith.constant 0 : index
    %c0_17 = arith.constant 0 : index
    %30 = vector.load %arg6[%c0_16, %c0_17] : memref<128x128xbf16, #tpu.memory_space<vmem>>, vector<128x128xbf16>
    %cst_18 = arith.constant dense<0.000000e+00> : vector<128x128xf32>
    %31 = tpu.matmul %29, %30, %cst_18 {dimension_numbers = #tpu.dot_dimension_numbers<[1], [0], [0], [1], [0, 0, 1, 1], [], []>} : vector<128x128xbf16>, vector<128x128xbf16>, vector<128x128xf32> -> vector<128x128xf32>
    %c0_19 = arith.constant 0 : index
    %c0_20 = arith.constant 0 : index
    %32 = vector.load %arg7[%c0_19, %c0_20] : memref<1x128xf32, #tpu.memory_space<vmem>>, vector<1x128xf32>
    %33 = vector.broadcast %32 : vector<1x128xf32> to vector<128x128xf32>
    %34 = arith.addf %31, %33 : vector<128x128xf32>
    %c0_21 = arith.constant 0 : index
    %c0_22 = arith.constant 0 : index
    %35 = vector.load %arg8[%c0_21, %c0_22] : memref<128x128xf32, #tpu.memory_space<vmem>>, vector<128x128xf32>
    tpu.vector_store %arg8[%c0_21, %c0_22], %34 {strides = array<i32>} : memref<128x128xf32, #tpu.memory_space<vmem>>, vector<128x128xf32>,
    return
  }
  func.func @transform_0(%arg0: i32) -> (i32, i32) {
    %c0_i32 = arith.constant 0 : i32
    %c0_i32_0 = arith.constant 0 : i32
    return %arg0, %c0_i32 : i32, i32
  }
  func.func @transform_1(%arg0: i32) -> (i32, i32) {
    %c0_i32 = arith.constant 0 : i32
    %c0_i32_0 = arith.constant 0 : i32
    %c0_i32_1 = arith.constant 0 : i32
    return %c0_i32, %c0_i32_0 : i32, i32
  }
  func.func @transform_2(%arg0: i32) -> (i32, i32) {
    %c0_i32 = arith.constant 0 : i32
    %c0_i32_0 = arith.constant 0 : i32
    %c0_i32_1 = arith.constant 0 : i32
    return %c0_i32, %c0_i32_0 : i32, i32
  }
  func.func @transform_3(%arg0: i32) -> (i32, i32) {
    %c0_i32 = arith.constant 0 : i32
    %c0_i32_0 = arith.constant 0 : i32
    %c0_i32_1 = arith.constant 0 : i32
    return %c0_i32, %c0_i32_0 : i32, i32
  }
  func.func @transform_4(%arg0: i32) -> (i32, i32) {
    %c0_i32 = arith.constant 0 : i32
    %c0_i32_0 = arith.constant 0 : i32
    %c0_i32_1 = arith.constant 0 : i32
    return %c0_i32, %c0_i32_0 : i32, i32
  }
  func.func @transform_5(%arg0: i32) -> (i32, i32) {
    %c0_i32 = arith.constant 0 : i32
    %c0_i32_0 = arith.constant 0 : i32
    %c0_i32_1 = arith.constant 0 : i32
    return %c0_i32, %c0_i32_0 : i32, i32
  }
  func.func @transform_6(%arg0: i32) -> (i32, i32) {
    %c0_i32 = arith.constant 0 : i32
    %c0_i32_0 = arith.constant 0 : i32
    %c0_i32_1 = arith.constant 0 : i32
    return %c0_i32, %c0_i32_0 : i32, i32
  }
  func.func @transform_7(%arg0: i32) -> (i32, i32) {
    %c0_i32 = arith.constant 0 : i32
    %c0_i32_0 = arith.constant 0 : i32
    return %arg0, %c0_i32 : i32, i32
  }
}

</mosaic_0001>

<bundles_post_ra>
// kernel: coda_net_forward.1
= control target key start
LH: loop header
LB: loop body
LE: loop exit
PB: predicated region body
PF: predicated region fallthrough
CT: control target
= control target key end

     0   :  { %s1131_s24 = smov 0   ;;  %s1298_s0 = inlined_call_operand.vmem [shape: f32[256,32], index: 0, kind: input, shape index: {}]   ;;  %s1299_s1 = inlined_call_operand.vmem [shape: bf16[32,128], index: 1, kind: input, shape index: {}]   ;;  %s1300_s2 = inlined_call_operand.vmem [shape: f32[1,128], index: 2, kind: input, shape index: {}]   ;;  %s1301_s3 = inlined_call_operand.vmem [shape: bf16[128,128], index: 3, kind: input, shape index: {}]   ;;  %s1302_s4 = inlined_call_operand.vmem [shape: f32[1,128], index: 4, kind: input, shape index: {}]   ;;  %s1303_s5 = inlined_call_operand.vmem [shape: bf16[128,128], index: 5, kind: input, shape index: {}]   ;;  %s1304_s6 = inlined_call_operand.vmem [shape: f32[1,128], index: 6, kind: input, shape index: {}]   ;;  %s1305_s7 = inlined_call_operand.vmem [shape: f32[256,128], index: 7, kind: output, shape index: {}]  }
   0x1 LB: > { %s883_s25 = sadd.s32 4294967295, %s1089_s24   ;;  %p887_p0 = scmp.ge.s32.totalorder %s1089_s24, 1  ;;  %s1089_s24 = sphi %s1131_s24, %s17_s24  }
   0x2   : > { %p238_p1 = scmp.lt.s32.totalorder %s1089_s24, 3 }
   0x4   : > { %p239_p2 = pnand %p887_p0, %p238_p1 }
   0x5   : > { %s888_s28 = sshll.u32 (!%p239_p2), %s883_s25, 4 }
   0x6   : > { %242 = sbr.rel (%p239_p2) target bundleno = 586 (0x24a), region = 48  ;;  %p271_p3 = scmp.lt.s32.totalorder (!%p239_p2), %s888_s28, 31 }
   0xb   : > { %v975_v0 = vld [vmem:[%s1299_s1 + $0x8] sm:$0xff]  ;;  %v974_v1 = vld [vmem:[%s1299_s1] sm:$0xff]  ;;  %s1307_s28 = smov (!%p271_p3, %s888_s28), 31  ;;  %vm327_vm0 = vcmask 261120   ;;  %v983_v20 = vld [vmem:[%s1301_s3 + $0x38] sm:$0xff] }
   0xc   : > { %358 = vmatpush.bf16.msra.mxu0 %v975_v0  ;;  %s889_s8 = sshll.u32 %s1307_s28, 3  ;;  %557 = vmatpush.bf16.msra.mxu1 %v983_v20  ;;  %v982_v24 = vld [vmem:[%s1301_s3 + $0x30] sm:$0xff]  ;;  %v981_v25 = vld [vmem:[%s1301_s3 + $0x28] sm:$0xff]  ;;  %v980_v26 = vld [vmem:[%s1301_s3 + $0x20] sm:$0xff] }
   0xd   : > { %s1153_s11 = scalar_lea.vmem %s1298_s0, %s889_s8  ;;  %992 = vmatpush.bf16.msra.mxu3 %v983_v20  ;;  %v979_v27 = vld [vmem:[%s1301_s3 + $0x18] sm:$0xff]  ;;  %v978_v31 = vld [vmem:[%s1301_s3 + $0x10] sm:$0xff]  ;;  %v977_v32 = vld [vmem:[%s1301_s3 + $0x8] sm:$0xff]  ;;  %s1277_s12 = scalar_lea.vmem %s1305_s7, %s889_s8 }
   0xe   : > { %v283_v2 = vld [vmem:[%s1153_s11] sm:$0xff]  ;;  %v284_v3 = vld [vmem:[%s1153_s11 + $0x8] sm:$0xff]  ;;  %v285_v5 = vld [vmem:[%s1153_s11 + $0x10] sm:$0xff] }
   0xf   : > { %v299_v4 = vpack.c.bf16 %v284_v3, %v283_v2  ;;  %v286_v6 = vld [vmem:[%s1153_s11 + $0x18] sm:$0xff]  ;;  %v287_v8 = vld [vmem:[%s1153_s11 + $0x20] sm:$0xff]  ;;  %v288_v9 = vld [vmem:[%s1153_s11 + $0x28] sm:$0xff] }
  0x10   : > { %359 = vmatpush.bf16.msra.mxu0 %v974_v1  ;;  %v300_v7 = vpack.c.bf16 %v286_v6, %v285_v5  ;;  %v301_v10 = vpack.c.bf16 %v288_v9, %v287_v8  ;;  %v289_v11 = vld [vmem:[%s1153_s11 + $0x30] sm:$0xff]  ;;  %v290_v12 = vld [vmem:[%s1153_s11 + $0x38] sm:$0xff]  ;;  %v291_v14 = vld [vmem:[%s1153_s11 + $0x40] sm:$0xff]  ;;  %558 = vmatpush.bf16.msra.mxu1 %v982_v24 }
  0x11   : > { %v302_v13 = vpack.c.bf16 %v290_v12, %v289_v11  ;;  %v292_v15 = vld [vmem:[%s1153_s11 + $0x48] sm:$0xff]  ;;  %v293_v17 = vld [vmem:[%s1153_s11 + $0x50] sm:$0xff]  ;;  %v294_v18 = vld [vmem:[%s1153_s11 + $0x58] sm:$0xff]  ;;  %993 = vmatpush.bf16.msra.mxu3 %v982_v24 }
  0x12   : > { %v303_v16 = vpack.c.bf16 %v292_v15, %v291_v14  ;;  %v304_v19 = vpack.c.bf16 %v294_v18, %v293_v17  ;;  %v295_v21 = vld [vmem:[%s1153_s11 + $0x60] sm:$0xff]  ;;  %v296_v22 = vld [vmem:[%s1153_s11 + $0x68] sm:$0xff]  ;;  %v297_v28 = vld [vmem:[%s1153_s11 + $0x70] sm:$0xff] }
  0x13   : > { %900 = vmatmul.msk.bf16.vlgmr.msra.gmra.mxu0 %vm327_vm0, %v299_v4  ;;  %v305_v23 = vpack.c.bf16 %v296_v22, %v295_v21  ;;  %v298_v29 = vld [vmem:[%s1153_s11 + $0x78] sm:$0xff]  ;;  %v976_v33 = vld [vmem:[%s1301_s3] sm:$0xff] }
  0x14   : > { %559 = vmatpush.bf16.msra.mxu1 %v981_v25  ;;  %v306_v30 = vpack.c.bf16 %v298_v29, %v297_v28  ;;  %v1206_v34 = vld [vmem:[%s1300_s2] ss:$0 sm:$0xff] }
  0x15   : > { %994 = vmatpush.bf16.msra.mxu3 %v981_v25 }
  0x18   : > { %560 = vmatpush.bf16.msra.mxu1 %v980_v26 }
  0x19   : > { %995 = vmatpush.bf16.msra.mxu3 %v980_v26 }
  0x1c   : > { %561 = vmatpush.bf16.msra.mxu1 %v979_v27 }
  0x1d   : > { %996 = vmatpush.bf16.msra.mxu3 %v979_v27 }
  0x20   : > { %562 = vmatpush.bf16.msra.mxu1 %v978_v31 }
  0x21   : > { %997 = vmatpush.bf16.msra.mxu3 %v978_v31 }
  0x23   : > { %901 = vmatmul.msk.bf16.gmra.mxu0 %vm327_vm0, %v300_v7 }
  0x24   : > { %563 = vmatpush.bf16.msra.mxu1 %v977_v32 }
  0x25   : > { %998 = vmatpush.bf16.msra.mxu3 %v977_v32 }
  0x28   : > { %564 = vmatpush.bf16.msra.mxu1 %v976_v33 }
  0x29   : > { %999 = vmatpush.bf16.msra.mxu3 %v976_v33 }
  0x33   : > { %902 = vmatmul.msk.bf16.gmra.mxu0 %vm327_vm0, %v301_v10 }
  0x43   : > { %903 = vmatmul.msk.bf16.gmra.mxu0 %vm327_vm0, %v302_v13 }
  0x53   : > { %904 = vmatmul.msk.bf16.gmra.mxu0 %vm327_vm0, %v303_v16 }
  0x63   : > { %905 = vmatmul.msk.bf16.gmra.mxu0 %vm327_vm0, %v304_v19 }
  0x73   : > { %906 = vmatmul.msk.bf16.gmra.mxu0 %vm327_vm0, %v305_v23 }
  0x83   : > { %907 = vmatmul.msk.bf16.gmra.mxu0 %vm327_vm0, %v306_v30 }
  0x90   : > { %v361_v35 = vpop.f32.mrf.mxu0 }
  0x91   : > { %v362_v36 = vadd.f32 %v1206_v34, %v361_v35 }
  0x93   : > { %v401_v37 = vmul.f32 0.5, %v362_v36 }
  0x95   : > { %1019 = vtanh.f32 %v401_v37 }
  0x98   : > { %v363_v38 = vpop.f32.mrf.mxu0 }
  0x99   : > { %v364_v39 = vadd.f32 %v1206_v34, %v363_v38 }
  0x9b   : > { %v402_v40 = vmul.f32 0.5, %v364_v39  ;;  %v1020_v41 = vpop.eup %1019 }
  0x9c   : > { %v433_v42 = vmul.f32 0.5, %v1020_v41 }
  0x9d   : > { %1021 = vtanh.f32 %v402_v40 }
  0x9e   : > { %v449_v47 = vadd.f32 0.5, %v433_v42 }
  0xa0   : > { %v366_v43 = vpop.f32.mrf.mxu0  ;;  %v465_v50 = vmul.f32 %v449_v47, %v362_v36 }
  0xa1   : > { %v367_v44 = vadd.f32 %v1206_v34, %v366_v43 }
  0xa3   : > { %v1022_v45 = vpop.eup %1021  ;;  %v403_v46 = vmul.f32 0.5, %v367_v44 }
  0xa4   : > { %v434_v48 = vmul.f32 0.5, %v1022_v45 }
  0xa5   : > { %1023 = vtanh.f32 %v403_v46 }
  0xa6   : > { %v450_v49 = vadd.f32 0.5, %v434_v48 }
  0xa8   : > { %v466_v51 = vmul.f32 %v450_v49, %v364_v39  ;;  %v368_v52 = vpop.f32.mrf.mxu0 }
  0xa9   : > { %v369_v53 = vadd.f32 %v1206_v34, %v368_v52 }
  0xaa   : > { %v481_v54 = vpack.c.bf16 %v466_v51, %v465_v50 }
  0xab   : > { %v404_v55 = vmul.f32 0.5, %v369_v53  ;;  %v1024_v56 = vpop.eup %1023 }
  0xac   : > { %565 = vmatmul.bf16.vlgmr.msra.gmra.mxu1 %v481_v54  ;;  %v435_v57 = vmul.f32 0.5, %v1024_v56 }
  0xad   : > { %1025 = vtanh.f32 %v404_v55 }
  0xae   : > { %v451_v62 = vadd.f32 0.5, %v435_v57 }
  0xb0   : > { %v371_v58 = vpop.f32.mrf.mxu0  ;;  %v467_v1 = vmul.f32 %v451_v62, %v367_v44 }
  0xb1   : > { %v372_v59 = vadd.f32 %v1206_v34, %v371_v58 }
  0xb3   : > { %v1026_v60 = vpop.eup %1025  ;;  %v405_v61 = vmul.f32 0.5, %v372_v59 }
  0xb4   : > { %v436_v63 = vmul.f32 0.5, %v1026_v60 }
  0xb5   : > { %1027 = vtanh.f32 %v405_v61 }
  0xb6   : > { %v452_v0 = vadd.f32 0.5, %v436_v63 }
  0xb8   : > { %v468_v2 = vmul.f32 %v452_v0, %v369_v53  ;;  %v373_v3 = vpop.f32.mrf.mxu0 }
  0xb9   : > { %v374_v4 = vadd.f32 %v1206_v34, %v373_v3 }
  0xba   : > { %v482_v5 = vpack.c.bf16 %v468_v2, %v467_v1 }
  0xbb   : > { %v406_v6 = vmul.f32 0.5, %v374_v4  ;;  %v1028_v7 = vpop.eup %1027 }
  0xbc   : > { %570 = vmatmul.bf16.gmra.mxu1 %v482_v5  ;;  %v437_v8 = vmul.f32 0.5, %v1028_v7 }
  0xbd   : > { %1029 = vtanh.f32 %v406_v6 }
  0xbe   : > { %v453_v13 = vadd.f32 0.5, %v437_v8 }
  0xc0   : > { %v376_v9 = vpop.f32.mrf.mxu0  ;;  %v469_v16 = vmul.f32 %v453_v13, %v372_v59 }
  0xc1   : > { %v377_v10 = vadd.f32 %v1206_v34, %v376_v9 }
  0xc3   : > { %v1030_v11 = vpop.eup %1029  ;;  %v407_v12 = vmul.f32 0.5, %v377_v10 }
  0xc4   : > { %v438_v14 = vmul.f32 0.5, %v1030_v11 }
  0xc5   : > { %1031 = vtanh.f32 %v407_v12 }
  0xc6   : > { %v454_v15 = vadd.f32 0.5, %v438_v14 }
  0xc8   : > { %v470_v17 = vmul.f32 %v454_v15, %v374_v4  ;;  %v378_v18 = vpop.f32.mrf.mxu0  ;;  %v991_v4 = vld [vmem:[%s1303_s5 + $0x38] sm:$0xff] }
  0xc9   : > { %v379_v19 = vadd.f32 %v1206_v34, %v378_v18  ;;  %762 = vmatpush.bf16.msra.mxu2 %v991_v4  ;;  %1000 = vmatpush.bf16.msrb.mxu3 %v991_v4 }
  0xca   : > { %v483_v20 = vpack.c.bf16 %v470_v17, %v469_v16  ;;  %v990_v17 = vld [vmem:[%s1303_s5 + $0x30] sm:$0xff] }
  0xcb   : > { %v408_v21 = vmul.f32 0.5, %v379_v19  ;;  %v1032_v22 = vpop.eup %1031 }
  0xcc   : > { %575 = vmatmul.bf16.gmra.mxu1 %v483_v20  ;;  %v439_v23 = vmul.f32 0.5, %v1032_v22 }
  0xcd   : > { %1033 = vtanh.f32 %v408_v21  ;;  %763 = vmatpush.bf16.msra.mxu2 %v990_v17  ;;  %1001 = vmatpush.bf16.msrb.mxu3 %v990_v17  ;;  %v989_v21 = vld [vmem:[%s1303_s5 + $0x28] sm:$0xff] }
  0xce   : > { %v455_v28 = vadd.f32 0.5, %v439_v23 }
  0xd0   : > { %v381_v24 = vpop.f32.mrf.mxu0  ;;  %v471_v31 = vmul.f32 %v455_v28, %v377_v10 }
  0xd1   : > { %v382_v25 = vadd.f32 %v1206_v34, %v381_v24  ;;  %764 = vmatpush.bf16.msra.mxu2 %v989_v21  ;;  %1002 = vmatpush.bf16.msrb.mxu3 %v989_v21  ;;  %v988_v24 = vld [vmem:[%s1303_s5 + $0x20] sm:$0xff] }
  0xd3   : > { %v1034_v26 = vpop.eup %1033  ;;  %v409_v27 = vmul.f32 0.5, %v382_v25 }
  0xd4   : > { %v440_v29 = vmul.f32 0.5, %v1034_v26 }
  0xd5   : > { %1035 = vtanh.f32 %v409_v27  ;;  %765 = vmatpush.bf16.msra.mxu2 %v988_v24  ;;  %1003 = vmatpush.bf16.msrb.mxu3 %v988_v24  ;;  %v987_v27 = vld [vmem:[%s1303_s5 + $0x18] sm:$0xff] }
  0xd6   : > { %v456_v30 = vadd.f32 0.5, %v440_v29 }
  0xd8   : > { %v472_v32 = vmul.f32 %v456_v30, %v379_v19  ;;  %v383_v33 = vpop.f32.mrf.mxu0 }
  0xd9   : > { %v384_v35 = vadd.f32 %v1206_v34, %v383_v33  ;;  %766 = vmatpush.bf16.msra.mxu2 %v987_v27  ;;  %1004 = vmatpush.bf16.msrb.mxu3 %v987_v27  ;;  %v985_v33 = vld [vmem:[%s1303_s5 + $0x8] sm:$0xff] }
  0xda   : > { %v484_v36 = vpack.c.bf16 %v472_v32, %v471_v31  ;;  %v986_v31 = vld [vmem:[%s1303_s5 + $0x10] sm:$0xff] }
  0xdb   : > { %v410_v37 = vmul.f32 0.5, %v384_v35  ;;  %v1036_v38 = vpop.eup %1035 }
  0xdc   : > { %580 = vmatmul.bf16.gmra.mxu1 %v484_v36  ;;  %v441_v39 = vmul.f32 0.5, %v1036_v38  ;;  %v1251_v36 = vld [vmem:[%s1302_s4] ss:$0 sm:$0xff] }
  0xdd   : > { %1037 = vtanh.f32 %v410_v37  ;;  %767 = vmatpush.bf16.msra.mxu2 %v986_v31  ;;  %1005 = vmatpush.bf16.msrb.mxu3 %v986_v31 }
  0xde   : > { %v457_v44 = vadd.f32 0.5, %v441_v39 }
  0xe0   : > { %v386_v40 = vpop.f32.mrf.mxu0  ;;  %v473_v47 = vmul.f32 %v457_v44, %v382_v25 }
  0xe1   : > { %v387_v41 = vadd.f32 %v1206_v34, %v386_v40  ;;  %768 = vmatpush.bf16.msra.mxu2 %v985_v33  ;;  %1006 = vmatpush.bf16.msrb.mxu3 %v985_v33 }
  0xe3   : > { %v1038_v42 = vpop.eup %1037  ;;  %v411_v43 = vmul.f32 0.5, %v387_v41 }
  0xe4   : > { %v442_v45 = vmul.f32 0.5, %v1038_v42 }
  0xe5   : > { %1039 = vtanh.f32 %v411_v43 }
  0xe6   : > { %v458_v46 = vadd.f32 0.5, %v442_v45 }
  0xe8   : > { %v474_v48 = vmul.f32 %v458_v46, %v384_v35  ;;  %v388_v49 = vpop.f32.mrf.mxu0  ;;  %v984_v35 = vld [vmem:[%s1303_s5] sm:$0xff] }
  0xe9   : > { %v389_v50 = vadd.f32 %v1206_v34, %v388_v49  ;;  %769 = vmatpush.bf16.msra.mxu2 %v984_v35  ;;  %1007 = vmatpush.bf16.msrb.mxu3 %v984_v35 }
  0xea   : > { %v485_v51 = vpack.c.bf16 %v474_v48, %v473_v47 }
  0xeb   : > { %v412_v52 = vmul.f32 0.5, %v389_v50  ;;  %v1040_v53 = vpop.eup %1039 }
  0xec   : > { %585 = vmatmul.bf16.gmra.mxu1 %v485_v51  ;;  %v443_v54 = vmul.f32 0.5, %v1040_v53 }
  0xed   : > { %1041 = vtanh.f32 %v412_v52 }
  0xee   : > { %v459_v59 = vadd.f32 0.5, %v443_v54 }
  0xf0   : > { %v391_v55 = vpop.f32.mrf.mxu0  ;;  %v475_v62 = vmul.f32 %v459_v59, %v387_v41 }
  0xf1   : > { %v392_v56 = vadd.f32 %v1206_v34, %v391_v55 }
  0xf3   : > { %v1042_v57 = vpop.eup %1041  ;;  %v413_v58 = vmul.f32 0.5, %v392_v56 }
  0xf4   : > { %v444_v60 = vmul.f32 0.5, %v1042_v57 }
  0xf5   : > { %1043 = vtanh.f32 %v413_v58 }
  0xf6   : > { %v460_v61 = vadd.f32 0.5, %v444_v60 }
  0xf8   : > { %v476_v63 = vmul.f32 %v460_v61, %v389_v50  ;;  %v393_v0 = vpop.f32.mrf.mxu0 }
  0xf9   : > { %v394_v1 = vadd.f32 %v1206_v34, %v393_v0 }
  0xfa   : > { %v486_v2 = vpack.c.bf16 %v476_v63, %v475_v62 }
  0xfb   : > { %v414_v3 = vmul.f32 0.5, %v394_v1  ;;  %v1044_v5 = vpop.eup %1043 }
  0xfc   : > { %590 = vmatmul.bf16.gmra.mxu1 %v486_v2  ;;  %v445_v6 = vmul.f32 0.5, %v1044_v5 }
  0xfd   : > { %1045 = vtanh.f32 %v414_v3 }
  0xfe   : > { %v461_v11 = vadd.f32 0.5, %v445_v6 }
 0x100   : > { %v396_v7 = vpop.f32.mrf.mxu0  ;;  %v477_v14 = vmul.f32 %v461_v11, %v392_v56 }
 0x101   : > { %v397_v8 = vadd.f32 %v1206_v34, %v396_v7 }
 0x103   : > { %v1046_v9 = vpop.eup %1045  ;;  %v415_v10 = vmul.f32 0.5, %v397_v8 }
 0x104   : > { %v446_v12 = vmul.f32 0.5, %v1046_v9 }
 0x105   : > { %1047 = vtanh.f32 %v415_v10 }
 0x106   : > { %v462_v13 = vadd.f32 0.5, %v446_v12 }
 0x108   : > { %v478_v15 = vmul.f32 %v462_v13, %v394_v1  ;;  %v398_v16 = vpop.f32.mrf.mxu0 }
 0x109   : > { %v399_v18 = vadd.f32 %v1206_v34, %v398_v16 }
 0x10a   : > { %v487_v19 = vpack.c.bf16 %v478_v15, %v477_v14 }
 0x10b   : > { %v416_v20 = vmul.f32 0.5, %v399_v18  ;;  %v1048_v22 = vpop.eup %1047 }
 0x10c   : > { %595 = vmatmul.bf16.vlgmr.msra.gmra.mxu3 %v487_v19  ;;  %v447_v23 = vmul.f32 0.5, %v1048_v22 }
 0x10d   : > { %1049 = vtanh.f32 %v416_v20 }
 0x10e   : > { %v463_v25 = vadd.f32 0.5, %v447_v23 }
 0x110   : > { %v479_v29 = vmul.f32 %v463_v25, %v397_v8 }
 0x113   : > { %v1050_v34 = vpop.eup %1049 }
 0x114   : > { %v448_v26 = vmul.f32 0.5, %v1050_v34 }
 0x116   : > { %v464_v28 = vadd.f32 0.5, %v448_v26 }
 0x118   : > { %v480_v30 = vmul.f32 %v464_v28, %v399_v18 }
 0x11a   : > { %v488_v32 = vpack.c.bf16 %v480_v30, %v479_v29 }
 0x11c   : > { %600 = vmatmul.bf16.gmra.mxu3 %v488_v32 }
 0x129   : > { %v566_v37 = vpop.f32.mrf.mxu1 }
 0x12a   : > { %v567_v38 = vadd.f32 %v1251_v36, %v566_v37 }
 0x12c   : > { %v606_v39 = vmul.f32 0.5, %v567_v38 }
 0x12e   : > { %1051 = vtanh.f32 %v606_v39 }
 0x131   : > { %v568_v40 = vpop.f32.mrf.mxu1 }
 0x132   : > { %v569_v41 = vadd.f32 %v1251_v36, %v568_v40 }
 0x134   : > { %v607_v42 = vmul.f32 0.5, %v569_v41  ;;  %v1052_v43 = vpop.eup %1051 }
 0x135   : > { %v638_v44 = vmul.f32 0.5, %v1052_v43 }
 0x136   : > { %1053 = vtanh.f32 %v607_v42 }
 0x137   : > { %v654_v49 = vadd.f32 0.5, %v638_v44 }
 0x139   : > { %v571_v45 = vpop.f32.mrf.mxu1  ;;  %v670_v52 = vmul.f32 %v654_v49, %v567_v38 }
 0x13a   : > { %v572_v46 = vadd.f32 %v1251_v36, %v571_v45 }
 0x13c   : > { %v1054_v47 = vpop.eup %1053  ;;  %v608_v48 = vmul.f32 0.5, %v572_v46 }
 0x13d   : > { %v639_v50 = vmul.f32 0.5, %v1054_v47 }
 0x13e   : > { %1055 = vtanh.f32 %v608_v48 }
 0x13f   : > { %v655_v51 = vadd.f32 0.5, %v639_v50 }
 0x141   : > { %v671_v53 = vmul.f32 %v655_v51, %v569_v41  ;;  %v573_v54 = vpop.f32.mrf.mxu1 }
 0x142   : > { %v574_v55 = vadd.f32 %v1251_v36, %v573_v54 }
 0x143   : > { %v686_v56 = vpack.c.bf16 %v671_v53, %v670_v52 }
 0x144   : > { %v609_v57 = vmul.f32 0.5, %v574_v55  ;;  %v1056_v58 = vpop.eup %1055 }
 0x145   : > { %770 = vmatmul.bf16.vlgmr.msra.gmra.mxu2 %v686_v56  ;;  %v640_v59 = vmul.f32 0.5, %v1056_v58 }
 0x146   : > { %1057 = vtanh.f32 %v609_v57 }
 0x147   : > { %v656_v0 = vadd.f32 0.5, %v640_v59 }
 0x149   : > { %v576_v60 = vpop.f32.mrf.mxu1  ;;  %v672_v3 = vmul.f32 %v656_v0, %v572_v46 }
 0x14a   : > { %v577_v61 = vadd.f32 %v1251_v36, %v576_v60 }
 0x14c   : > { %v1058_v62 = vpop.eup %1057  ;;  %v610_v63 = vmul.f32 0.5, %v577_v61 }
 0x14d   : > { %v641_v1 = vmul.f32 0.5, %v1058_v62 }
 0x14e   : > { %1059 = vtanh.f32 %v610_v63 }
 0x14f   : > { %v657_v2 = vadd.f32 0.5, %v641_v1 }
 0x151   : > { %v673_v4 = vmul.f32 %v657_v2, %v574_v55  ;;  %v578_v5 = vpop.f32.mrf.mxu1 }
 0x152   : > { %v579_v6 = vadd.f32 %v1251_v36, %v578_v5 }
 0x153   : > { %v687_v7 = vpack.c.bf16 %v673_v4, %v672_v3 }
 0x154   : > { %v611_v8 = vmul.f32 0.5, %v579_v6  ;;  %v1060_v9 = vpop.eup %1059 }
 0x155   : > { %775 = vmatmul.bf16.gmra.mxu2 %v687_v7  ;;  %v642_v10 = vmul.f32 0.5, %v1060_v9 }
 0x156   : > { %1061 = vtanh.f32 %v611_v8 }
 0x157   : > { %v658_v15 = vadd.f32 0.5, %v642_v10 }
 0x159   : > { %v581_v11 = vpop.f32.mrf.mxu1  ;;  %v674_v18 = vmul.f32 %v658_v15, %v577_v61 }
 0x15a   : > { %v582_v12 = vadd.f32 %v1251_v36, %v581_v11 }
 0x15c   : > { %v1062_v13 = vpop.eup %1061  ;;  %v612_v14 = vmul.f32 0.5, %v582_v12 }
 0x15d   : > { %v643_v16 = vmul.f32 0.5, %v1062_v13 }
 0x15e   : > { %1063 = vtanh.f32 %v612_v14 }
 0x15f   : > { %v659_v17 = vadd.f32 0.5, %v643_v16 }
 0x161   : > { %v675_v19 = vmul.f32 %v659_v17, %v579_v6  ;;  %v583_v20 = vpop.f32.mrf.mxu1 }
 0x162   : > { %v584_v21 = vadd.f32 %v1251_v36, %v583_v20 }
 0x163   : > { %v688_v22 = vpack.c.bf16 %v675_v19, %v674_v18 }
 0x164   : > { %v613_v23 = vmul.f32 0.5, %v584_v21  ;;  %v1064_v24 = vpop.eup %1063 }
 0x165   : > { %780 = vmatmul.bf16.gmra.mxu2 %v688_v22  ;;  %v644_v34 = vmul.f32 0.5, %v1064_v24 }
 0x166   : > { %1065 = vtanh.f32 %v613_v23 }
 0x167   : > { %v660_v29 = vadd.f32 0.5, %v644_v34 }
 0x169   : > { %v586_v25 = vpop.f32.mrf.mxu1  ;;  %v676_v32 = vmul.f32 %v660_v29, %v582_v12  ;;  %v1018_v29 = vld [vmem:[%s1304_s6] ss:$0 sm:$0xff] }
 0x16a   : > { %v587_v26 = vadd.f32 %v1251_v36, %v586_v25 }
 0x16c   : > { %v1066_v27 = vpop.eup %1065  ;;  %v614_v28 = vmul.f32 0.5, %v587_v26 }
 0x16d   : > { %v645_v30 = vmul.f32 0.5, %v1066_v27 }
 0x16e   : > { %1067 = vtanh.f32 %v614_v28 }
 0x16f   : > { %v661_v31 = vadd.f32 0.5, %v645_v30 }
 0x171   : > { %v677_v33 = vmul.f32 %v661_v31, %v584_v21  ;;  %v588_v35 = vpop.f32.mrf.mxu1 }
 0x172   : > { %v589_v37 = vadd.f32 %v1251_v36, %v588_v35 }
 0x173   : > { %v689_v38 = vpack.c.bf16 %v677_v33, %v676_v32 }
 0x174   : > { %v615_v39 = vmul.f32 0.5, %v589_v37  ;;  %v1068_v40 = vpop.eup %1067 }
 0x175   : > { %785 = vmatmul.bf16.gmra.mxu2 %v689_v38  ;;  %v646_v41 = vmul.f32 0.5, %v1068_v40 }
 0x176   : > { %1069 = vtanh.f32 %v615_v39 }
 0x177   : > { %v662_v46 = vadd.f32 0.5, %v646_v41 }
 0x179   : > { %v591_v42 = vpop.f32.mrf.mxu1  ;;  %v678_v49 = vmul.f32 %v662_v46, %v587_v26 }
 0x17a   : > { %v592_v43 = vadd.f32 %v1251_v36, %v591_v42 }
 0x17c   : > { %v1070_v44 = vpop.eup %1069  ;;  %v616_v45 = vmul.f32 0.5, %v592_v43 }
 0x17d   : > { %v647_v47 = vmul.f32 0.5, %v1070_v44 }
 0x17e   : > { %1071 = vtanh.f32 %v616_v45 }
 0x17f   : > { %v663_v48 = vadd.f32 0.5, %v647_v47 }
 0x181   : > { %v679_v50 = vmul.f32 %v663_v48, %v589_v37  ;;  %v593_v51 = vpop.f32.mrf.mxu1 }
 0x182   : > { %v594_v52 = vadd.f32 %v1251_v36, %v593_v51 }
 0x183   : > { %v690_v53 = vpack.c.bf16 %v679_v50, %v678_v49 }
 0x184   : > { %v617_v54 = vmul.f32 0.5, %v594_v52  ;;  %v1072_v55 = vpop.eup %1071 }
 0x185   : > { %790 = vmatmul.bf16.gmra.mxu2 %v690_v53  ;;  %v648_v56 = vmul.f32 0.5, %v1072_v55 }
 0x186   : > { %1073 = vtanh.f32 %v617_v54 }
 0x187   : > { %v664_v58 = vadd.f32 0.5, %v648_v56 }
 0x189   : > { %v680_v63 = vmul.f32 %v664_v58, %v592_v43 }
 0x18c   : > { %v1074_v57 = vpop.eup %1073 }
 0x18d   : > { %v649_v59 = vmul.f32 0.5, %v1074_v57 }
 0x18f   : > { %v665_v60 = vadd.f32 0.5, %v649_v59  ;;  %v596_v61 = vpop.f32.mrf.mxu3 }
 0x190   : > { %v597_v62 = vadd.f32 %v1251_v36, %v596_v61 }
 0x191   : > { %v681_v0 = vmul.f32 %v665_v60, %v594_v52 }
 0x192   : > { %v618_v1 = vmul.f32 0.5, %v597_v62 }
 0x193   : > { %v691_v2 = vpack.c.bf16 %v681_v0, %v680_v63 }
 0x194   : > { %1075 = vtanh.f32 %v618_v1 }
 0x195   : > { %795 = vmatmul.bf16.gmra.mxu2 %v691_v2 }
 0x197   : > { %v598_v3 = vpop.f32.mrf.mxu3 }
 0x198   : > { %v599_v4 = vadd.f32 %v1251_v36, %v598_v3 }
 0x19a   : > { %v619_v5 = vmul.f32 0.5, %v599_v4  ;;  %v1076_v6 = vpop.eup %1075 }
 0x19b   : > { %v650_v7 = vmul.f32 0.5, %v1076_v6 }
 0x19c   : > { %1077 = vtanh.f32 %v619_v5 }
 0x19d   : > { %v666_v12 = vadd.f32 0.5, %v650_v7 }
 0x19f   : > { %v601_v8 = vpop.f32.mrf.mxu3  ;;  %v682_v15 = vmul.f32 %v666_v12, %v597_v62 }
 0x1a0   : > { %v602_v9 = vadd.f32 %v1251_v36, %v601_v8 }
 0x1a2   : > { %v1078_v10 = vpop.eup %1077  ;;  %v620_v11 = vmul.f32 0.5, %v602_v9 }
 0x1a3   : > { %v651_v13 = vmul.f32 0.5, %v1078_v10 }
 0x1a4   : > { %1079 = vtanh.f32 %v620_v11 }
 0x1a5   : > { %v667_v14 = vadd.f32 0.5, %v651_v13 }
 0x1a7   : > { %v683_v16 = vmul.f32 %v667_v14, %v599_v4  ;;  %v603_v17 = vpop.f32.mrf.mxu3 }
 0x1a8   : > { %v604_v18 = vadd.f32 %v1251_v36, %v603_v17 }
 0x1a9   : > { %v692_v19 = vpack.c.bf16 %v683_v16, %v682_v15 }
 0x1aa   : > { %v621_v20 = vmul.f32 0.5, %v604_v18  ;;  %v1080_v21 = vpop.eup %1079 }
 0x1ab   : > { %800 = vmatmul.bf16.vlgmr.msrb.gmra.mxu3 %v692_v19  ;;  %v652_v22 = vmul.f32 0.5, %v1080_v21 }
 0x1ac   : > { %1081 = vtanh.f32 %v621_v20 }
 0x1ad   : > { %v668_v24 = vadd.f32 0.5, %v652_v22 }
 0x1af   : > { %v684_v26 = vmul.f32 %v668_v24, %v602_v9 }
 0x1b2   : > { %v1082_v23 = vpop.eup %1081 }
 0x1b3   : > { %v653_v34 = vmul.f32 0.5, %v1082_v23 }
 0x1b5   : > { %v669_v25 = vadd.f32 0.5, %v653_v34 }
 0x1b7   : > { %v685_v27 = vmul.f32 %v669_v25, %v604_v18 }
 0x1b9   : > { %v693_v28 = vpack.c.bf16 %v685_v27, %v684_v26 }
 0x1bb   : > { %805 = vmatmul.bf16.gmra.mxu3 %v693_v28 }
 0x1c8   : > { %v771_v36 = vpop.f32.mrf.mxu2 }
 0x1c9   : > { %v772_v30 = vadd.f32 %v1018_v29, %v771_v36 }
 0x1cb   : > { %811 = vst [vmem:[%s1277_s12] sm:$0xff] %v772_v30 }
 0x1d0   : > { %v773_v31 = vpop.f32.mrf.mxu2 }
 0x1d1   : > { %v774_v32 = vadd.f32 %v1018_v29, %v773_v31 }
 0x1d3   : > { %812 = vst [vmem:[%s1277_s12 + $0x8] sm:$0xff] %v774_v32 }
 0x1d8   : > { %v776_v33 = vpop.f32.mrf.mxu2 }
 0x1d9   : > { %v777_v35 = vadd.f32 %v1018_v29, %v776_v33 }
 0x1db   : > { %813 = vst [vmem:[%s1277_s12 + $0x10] sm:$0xff] %v777_v35 }
 0x1e0   : > { %v778_v37 = vpop.f32.mrf.mxu2 }
 0x1e1   : > { %v779_v38 = vadd.f32 %v1018_v29, %v778_v37 }
 0x1e3   : > { %814 = vst [vmem:[%s1277_s12 + $0x18] sm:$0xff] %v779_v38 }
 0x1e8   : > { %v781_v39 = vpop.f32.mrf.mxu2 }
 0x1e9   : > { %v782_v40 = vadd.f32 %v1018_v29, %v781_v39 }
 0x1eb   : > { %815 = vst [vmem:[%s1277_s12 + $0x20] sm:$0xff] %v782_v40 }
 0x1f0   : > { %v783_v41 = vpop.f32.mrf.mxu2 }
 0x1f1   : > { %v784_v42 = vadd.f32 %v1018_v29, %v783_v41 }
 0x1f3   : > { %816 = vst [vmem:[%s1277_s12 + $0x28] sm:$0xff] %v784_v42 }
 0x1f8   : > { %v786_v43 = vpop.f32.mrf.mxu2 }
 0x1f9   : > { %v787_v44 = vadd.f32 %v1018_v29, %v786_v43 }
 0x1fb   : > { %817 = vst [vmem:[%s1277_s12 + $0x30] sm:$0xff] %v787_v44 }
 0x200   : > { %v788_v45 = vpop.f32.mrf.mxu2 }
 0x201   : > { %v789_v46 = vadd.f32 %v1018_v29, %v788_v45 }
 0x203   : > { %818 = vst [vmem:[%s1277_s12 + $0x38] sm:$0xff] %v789_v46 }
 0x208   : > { %v791_v47 = vpop.f32.mrf.mxu2 }
 0x209   : > { %v792_v48 = vadd.f32 %v1018_v29, %v791_v47 }
 0x20b   : > { %819 = vst [vmem:[%s1277_s12 + $0x40] sm:$0xff] %v792_v48 }
 0x210   : > { %v793_v49 = vpop.f32.mrf.mxu2 }
 0x211   : > { %v794_v50 = vadd.f32 %v1018_v29, %v793_v49 }
 0x213   : > { %820 = vst [vmem:[%s1277_s12 + $0x48] sm:$0xff] %v794_v50 }
 0x218   : > { %v796_v51 = vpop.f32.mrf.mxu2 }
 0x219   : > { %v797_v52 = vadd.f32 %v1018_v29, %v796_v51 }
 0x21b   : > { %821 = vst [vmem:[%s1277_s12 + $0x50] sm:$0xff] %v797_v52 }
 0x220   : > { %v798_v53 = vpop.f32.mrf.mxu2 }
 0x221   : > { %v799_v54 = vadd.f32 %v1018_v29, %v798_v53 }
 0x223   : > { %822 = vst [vmem:[%s1277_s12 + $0x58] sm:$0xff] %v799_v54 }
 0x22e   : > { %v801_v55 = vpop.f32.mrf.mxu3 }
 0x22f   : > { %v802_v56 = vadd.f32 %v1018_v29, %v801_v55 }
 0x231   : > { %823 = vst [vmem:[%s1277_s12 + $0x60] sm:$0xff] %v802_v56 }
 0x236   : > { %v803_v57 = vpop.f32.mrf.mxu3 }
 0x237   : > { %v804_v58 = vadd.f32 %v1018_v29, %v803_v57 }
 0x239   : > { %824 = vst [vmem:[%s1277_s12 + $0x68] sm:$0xff] %v804_v58 }
 0x23e   : > { %v806_v59 = vpop.f32.mrf.mxu3 }
 0x23f   : > { %v807_v60 = vadd.f32 %v1018_v29, %v806_v59 }
 0x241   : > { %825 = vst [vmem:[%s1277_s12 + $0x70] sm:$0xff] %v807_v60 }
 0x246   : > { %v808_v61 = vpop.f32.mrf.mxu3 }
 0x247   : > { %v809_v62 = vadd.f32 %v1018_v29, %v808_v61 }
 0x249   : > { %826 = vst [vmem:[%s1277_s12 + $0x78] sm:$0xff] %v809_v62 }
 0x24a PF: > { %s17_s24 = sadd.s32 1, %s1089_s24  }
 0x24b   : > { %p14_p4 = scmp.ge.s32.totalorder %s17_s24, 4  }
 0x24d   :  { %16 = sbr.rel (!%p14_p4) target bundleno = 1 (0x1), region = 78 }

</bundles_post_ra>
